<compile_context>
chip_gen: v6e
topology: v6e:2x2x1
jax: 0.10.0
libtpu: 0.0.40
codegen_flags: <defaults>
</compile_context>

<pallas_src>
import functools
import math

import jax
import jax.numpy as jnp
from jax.experimental import pallas as pl
from jax.experimental.pallas import tpu as pltpu


def autopad(k, p=None):
    if p is None:
        p = k // 2 if isinstance(k, int) else [x // 2 for x in k]
    return p


# ---------------------------------------------------------------------------
# Pallas kernel: tiled matmul + (folded-BN) bias + Hardswish
# ---------------------------------------------------------------------------
def _matmul_bias_act_kernel(x_ref, w_ref, b_ref, o_ref, *, act):
    # x_ref: (TM, Cin_eff) f32/bf16, w_ref: (Cin_eff, Cout) bf16 (BN scale folded),
    # b_ref: (1, Cout) f32, o_ref: (TM, Cout) f32
    x = x_ref[...].astype(jnp.bfloat16)
    y = jnp.dot(x, w_ref[...], preferred_element_type=jnp.float32)
    y = y + b_ref[...]
    if act:
        # Hardswish: y * relu6(y + 3) / 6
        y = y * jnp.clip(y + 3.0, 0.0, 6.0) * (1.0 / 6.0)
    o_ref[...] = y.astype(o_ref.dtype)


def _choose_tm(M, cin, cout, in_bytes, budget=8 << 20):
    """Pick an M-tile: multiple of 8, double-buffered in+out tiles under `budget`."""
    per_row = 2 * (cin * in_bytes + cout * 4)  # 2x for double buffering
    tm = max(8, budget // max(per_row, 1))
    tm = min(tm, 2048)
    tm = (tm // 8) * 8
    if tm >= M:
        return M
    return tm


def matmul_bias_act(x_flat, w_bf16, bias, *, act=True, tm=None):
    """x_flat: (M, Cin_eff); w_bf16: (Cin_eff, Cout) bf16; bias: (1, Cout) f32."""
    M, cin = x_flat.shape
    cout = w_bf16.shape[1]
    if tm is None:
        tm = _choose_tm(M, cin, cout, x_flat.dtype.itemsize)
    grid = (pl.cdiv(M, tm),)
    kern = functools.partial(_matmul_bias_act_kernel, act=act)
    return pl.pallas_call(
        kern,
        out_shape=jax.ShapeDtypeStruct((M, cout), jnp.float32),
        grid=grid,
        in_specs=[
            pl.BlockSpec((tm, cin), lambda i: (i, 0)),     # activation rows (tiled)
            pl.BlockSpec((cin, cout), lambda i: (0, 0)),   # weight (resident)
            pl.BlockSpec((1, cout), lambda i: (0, 0)),     # bias (resident)
        ],
        out_specs=pl.BlockSpec((tm, cout), lambda i: (i, 0)),
        compiler_params=pltpu.CompilerParams(
            dimension_semantics=("parallel",)),
    )(x_flat, w_bf16, bias)


# ---------------------------------------------------------------------------
# im2col (cheap slicing; no-op for the default k=1, s=1 path)
# ---------------------------------------------------------------------------
def _extract_patches(x_nhwc, k, s, p):
    N, H, W, C = x_nhwc.shape
    if p > 0:
        x_nhwc = jnp.pad(x_nhwc, ((0, 0), (p, p), (p, p), (0, 0)))
    Hp, Wp = H + 2 * p, W + 2 * p
    Ho = (Hp - k) // s + 1
    Wo = (Wp - k) // s + 1
    if k == 1 and s == 1:
        return x_nhwc, Ho, Wo
    cols = []
    for dy in range(k):
        for dx in range(k):
            cols.append(
                x_nhwc[:, dy:dy + s * (Ho - 1) + 1:s, dx:dx + s * (Wo - 1) + 1:s, :])
    return jnp.concatenate(cols, axis=-1), Ho, Wo


# ---------------------------------------------------------------------------
# Conv forward (Conv2d(bias=False) + folded BN + Hardswish), NCHW in/out
# ---------------------------------------------------------------------------
def conv_forward(x_nchw, params, *, k=1, s=1, p=None, g=1, act=True, tm=None):
    if g != 1:
        # TODO(synk): grouped conv (g > 1) not implemented in the Pallas path.
        raise NotImplementedError("groups > 1 not supported")
    p = autopad(k, p)
    x = jnp.transpose(x_nchw, (0, 2, 3, 1))                 # NCHW -> NHWC
    cols, Ho, Wo = _extract_patches(x, k, s, p)
    N = x.shape[0]
    cin_eff = cols.shape[-1]
    cout = params["w"].shape[-1]
    x_flat = cols.reshape(N * Ho * Wo, cin_eff)
    out = matmul_bias_act(x_flat, params["w"], params["b"], act=act, tm=tm)
    out = out.reshape(N, Ho, Wo, cout)
    return jnp.transpose(out, (0, 3, 1, 2))                 # NHWC -> NCHW


# ---------------------------------------------------------------------------
# Parameter construction: torch-layout conv weight + BN, folded to (w, b)
# ---------------------------------------------------------------------------
def make_conv_params(key, c1, c2, k=1, eps=1e-5):
    ks = jax.random.split(key, 5)
    w_pt = jax.random.normal(ks[0], (c2, c1, k, k), jnp.float32) / math.sqrt(c1 * k * k)
    gamma = 1.0 + 0.1 * jax.random.normal(ks[1], (c2,), jnp.float32)
    beta = 0.1 * jax.random.normal(ks[2], (c2,), jnp.float32)
    mean = 0.1 * jax.random.normal(ks[3], (c2,), jnp.float32)
    var = jnp.abs(jax.random.normal(ks[4], (c2,), jnp.float32)) + 0.5
    scale = gamma / jnp.sqrt(var + eps)
    bias = beta - mean * scale
    # (Cout, Cin, k, k) -> (k, k, Cin, Cout) -> (k*k*Cin, Cout); fold BN scale in.
    w_mat = jnp.transpose(w_pt, (2, 3, 1, 0)).reshape(k * k * c1, c2) * scale[None, :]
    return dict(w=w_mat.astype(jnp.bfloat16),
                b=bias.reshape(1, c2).astype(jnp.float32))


# ---------------------------------------------------------------------------
# Pure-JAX reference (XLA conv on the same folded/bf16 weights)
# ---------------------------------------------------------------------------
def conv_reference(x_nchw, params, *, k=1, s=1, p=None, act=True):
    p = autopad(k, p)
    c2 = params["w"].shape[-1]
    c1 = params["w"].shape[0] // (k * k)
    w_hwio = params["w"].reshape(k, k, c1, c2)
    x = jnp.transpose(x_nchw, (0, 2, 3, 1)).astype(jnp.bfloat16)
    y = jax.lax.conv_general_dilated(
        x, w_hwio, window_strides=(s, s), padding=[(p, p), (p, p)],
        dimension_numbers=("NHWC", "HWIO", "NHWC"),
        preferred_element_type=jnp.float32)
    y = y + params["b"].reshape(1, 1, 1, c2)
    if act:
        y = y * jnp.clip(y + 3.0, 0.0, 6.0) / 6.0
    return jnp.transpose(y, (0, 3, 1, 2))


if __name__ == "__main__":
    key = jax.random.PRNGKey(0)
    kx, kp1, kp2, kp3 = jax.random.split(key, 4)

    N, C1, H, W = 2, 4, 16, 16
    C2 = 8
    x = jax.random.normal(kx, (N, C1, H, W), jnp.float32)

    # Case 1: Conv(4, 8) defaults -> 1x1, stride 1, Hardswish
    p1 = make_conv_params(kp1, C1, C2, k=1)
    fwd1 = jax.jit(functools.partial(conv_forward, k=1, s=1, act=True))
    out1 = jax.block_until_ready(fwd1(x, p1))
    ref1 = conv_reference(x, p1, k=1, s=1, act=True)
    assert out1.shape == (N, C2, H, W), out1.shape
    assert jnp.allclose(out1, ref1, atol=1e-2, rtol=1e-2), \
        float(jnp.max(jnp.abs(out1 - ref1)))

    # Case 2: Conv(4, 8, k=3, s=2) -> 3x3, stride 2, autopad=1
    p2 = make_conv_params(kp2, C1, C2, k=3)
    fwd2 = jax.jit(functools.partial(conv_forward, k=3, s=2, act=True))
    out2 = jax.block_until_ready(fwd2(x, p2))
    ref2 = conv_reference(x, p2, k=3, s=2, act=True)
    assert out2.shape == (N, C2, H // 2, W // 2), out2.shape
    assert jnp.allclose(out2, ref2, atol=1e-2, rtol=1e-2), \
        float(jnp.max(jnp.abs(out2 - ref2)))

    # Case 3: act=False (Identity), non-divisible M (2*10*10=200) with explicit
    # small tile to exercise the tiled / partial-edge-block path.
    x3 = jax.random.normal(jax.random.fold_in(kx, 3), (N, C1, 10, 10), jnp.float32)
    p3 = make_conv_params(kp3, C1, C2, k=1)
    fwd3 = jax.jit(functools.partial(conv_forward, k=1, s=1, act=False, tm=128))
    out3 = jax.block_until_ready(fwd3(x3, p3))
    ref3 = conv_reference(x3, p3, k=1, s=1, act=False)
    assert out3.shape == (N, C2, 10, 10), out3.shape
    assert jnp.allclose(out3, ref3, atol=1e-2, rtol=1e-2), \
        float(jnp.max(jnp.abs(out3 - ref3)))

    print("KERNEL_OK")
</pallas_src>

<mosaic_0001>
module attributes {stable_mosaic.version = 11 : i64} {
  func.func @_matmul_bias_act_kernel(%arg0: i32, %arg1: memref<512x4xf32, #tpu.memory_space<vmem>>, %arg2: memref<4x8xbf16, #tpu.memory_space<vmem>>, %arg3: memref<1x8xf32, #tpu.memory_space<vmem>>, %arg4: memref<512x8xf32, #tpu.memory_space<vmem>>) attributes {dimension_semantics = [#tpu.dimension_semantics<parallel>], iteration_bounds = array<i64: 1>, scalar_prefetch = 0 : i64, scratch_operands = 0 : i64, tpu.core_type = #tpu.core_type<tc>, window_params = [{transform_indices = @transform_0, window_bounds = array<i64: 512, 4>}, {pipeline_mode = #tpu.pipeline_mode<synchronous>, transform_indices = @transform_1, window_bounds = array<i64: 4, 8>}, {pipeline_mode = #tpu.pipeline_mode<synchronous>, transform_indices = @transform_2, window_bounds = array<i64: 1, 8>}, {transform_indices = @transform_3, window_bounds = array<i64: 512, 8>}]} {
    %c0 = arith.constant 0 : index
    %c0_0 = arith.constant 0 : index
    %0 = vector.load %arg1[%c0, %c0_0] : memref<512x4xf32, #tpu.memory_space<vmem>>, vector<512x4xf32>
    %1 = arith.truncf %0 : vector<512x4xf32> to vector<512x4xbf16>
    %c0_1 = arith.constant 0 : index
    %c0_2 = arith.constant 0 : index
    %2 = vector.load %arg2[%c0_1, %c0_2] : memref<4x8xbf16, #tpu.memory_space<vmem>>, vector<4x8xbf16>
    %cst = arith.constant dense<0.000000e+00> : vector<512x8xf32>
    %3 = tpu.matmul %1, %2, %cst {dimension_numbers = #tpu.dot_dimension_numbers<[1], [0], [0], [1], [0, 0, 1, 1], [], []>} : vector<512x4xbf16>, vector<4x8xbf16>, vector<512x8xf32> -> vector<512x8xf32>
    %c0_3 = arith.constant 0 : index
    %c0_4 = arith.constant 0 : index
    %4 = vector.load %arg3[%c0_3, %c0_4] : memref<1x8xf32, #tpu.memory_space<vmem>>, vector<1x8xf32>
    %5 = vector.broadcast %4 : vector<1x8xf32> to vector<512x8xf32>
    %6 = arith.addf %3, %5 : vector<512x8xf32>
    %cst_5 = arith.constant 3.000000e+00 : f32
    %7 = vector.broadcast %cst_5 : f32 to vector<512x8xf32>
    %8 = arith.addf %6, %7 : vector<512x8xf32>
    %cst_6 = arith.constant 0.000000e+00 : f32
    %cst_7 = arith.constant 6.000000e+00 : f32
    %9 = vector.broadcast %cst_6 : f32 to vector<512x8xf32>
    %10 = arith.maximumf %9, %8 : vector<512x8xf32>
    %11 = vector.broadcast %cst_7 : f32 to vector<512x8xf32>
    %12 = arith.minimumf %11, %10 : vector<512x8xf32>
    %13 = arith.mulf %6, %12 : vector<512x8xf32>
    %cst_8 = arith.constant 0.166666672 : f32
    %14 = vector.broadcast %cst_8 : f32 to vector<512x8xf32>
    %15 = arith.mulf %13, %14 : vector<512x8xf32>
    %c0_9 = arith.constant 0 : index
    %c0_10 = arith.constant 0 : index
    %16 = vector.load %arg4[%c0_9, %c0_10] : memref<512x8xf32, #tpu.memory_space<vmem>>, vector<512x8xf32>
    tpu.vector_store %arg4[%c0_9, %c0_10], %15 {strides = array<i32>} : memref<512x8xf32, #tpu.memory_space<vmem>>, vector<512x8xf32>,
    return
  }
  func.func @transform_0(%arg0: i32) -> (i32, i32) {
    %c0_i32 = arith.constant 0 : i32
    %c0_i32_0 = arith.constant 0 : i32
    return %arg0, %c0_i32 : i32, i32
  }
  func.func @transform_1(%arg0: i32) -> (i32, i32) {
    %c0_i32 = arith.constant 0 : i32
    %c0_i32_0 = arith.constant 0 : i32
    %c0_i32_1 = arith.constant 0 : i32
    return %c0_i32, %c0_i32_0 : i32, i32
  }
  func.func @transform_2(%arg0: i32) -> (i32, i32) {
    %c0_i32 = arith.constant 0 : i32
    %c0_i32_0 = arith.constant 0 : i32
    %c0_i32_1 = arith.constant 0 : i32
    return %c0_i32, %c0_i32_0 : i32, i32
  }
  func.func @transform_3(%arg0: i32) -> (i32, i32) {
    %c0_i32 = arith.constant 0 : i32
    %c0_i32_0 = arith.constant 0 : i32
    return %arg0, %c0_i32 : i32, i32
  }
}

</mosaic_0001>

<bundles_post_ra>
// kernel: conv_forward.1
= control target key start
LH: loop header
LB: loop body
LE: loop exit
PB: predicated region body
PF: predicated region fallthrough
CT: control target
= control target key end

     0   :  { %vm216_vm0 = vcmask 1041408   ;;  %vm119_vm1 = vcmask 31744   ;;  %vm829_vm2 = vcmask 64512   ;;  %s1672_s1 = inlined_call_operand.vmem [shape: bf16[4,8], index: 1, kind: input, shape index: {}]   ;;  %s1673_s0 = inlined_call_operand.vmem [shape: f32[512,4], index: 0, kind: input, shape index: {}]   ;;  %s1674_s2 = inlined_call_operand.vmem [shape: f32[1,8], index: 2, kind: input, shape index: {}]   ;;  %s1675_s3 = inlined_call_operand.vmem [shape: f32[512,8], index: 3, kind: output, shape index: {}]  }
   0x1   :  { %v111_v0 = vld [vmem:[%s1672_s1] sm:$0x3]  ;;  %v16_v2 = vld [vmem:[%s1673_s0 + $0x8] sm:$0xff]  ;;  %v17_v7 = vld [vmem:[%s1673_s0 + $0x10] sm:$0xff] }
   0x2   :  { %v15_v1 = vld [vmem:[%s1673_s0] sm:$0xff]  ;;  %1032 = vmatprep.subr.msk.bf16.mxu0 %vm216_vm0, %v111_v0  ;;  %1033 = vmatprep.subr.msk.bf16.mxu1 %vm216_vm0, %v111_v0  ;;  %v218_v3 = vsel %vm216_vm0, %v111_v0, 0  ;;  %v48_v6 = vld [vmem:[%s1673_s0 + $0x108] sm:$0xff]  ;;  %v18_v9 = vld [vmem:[%s1673_s0 + $0x18] sm:$0xff] }
   0x3   :  { %v79_v4 = vpack.c.bf16 %v16_v2, %v15_v1  ;;  %v47_v5 = vld [vmem:[%s1673_s0 + $0x100] sm:$0xff]  ;;  %965 = vmatpush3.bf16.msra.mxu0 %v218_v3  ;;  %1031 = vmatpush3.bf16.msra.mxu1 %v218_v3  ;;  %v49_v10 = vld [vmem:[%s1673_s0 + $0x110] sm:$0xff]  ;;  %v50_v11 = vld [vmem:[%s1673_s0 + $0x118] sm:$0xff]  ;;  %v80_v12 = vpack.c.bf16 %v18_v9, %v17_v7 }
   0x4   :  { %v95_v8 = vpack.c.bf16 %v48_v6, %v47_v5  ;;  %v96_v13 = vpack.c.bf16 %v50_v11, %v49_v10  ;;  %v19_v14 = vld [vmem:[%s1673_s0 + $0x20] sm:$0xff]  ;;  %v20_v15 = vld [vmem:[%s1673_s0 + $0x28] sm:$0xff]  ;;  %v21_v20 = vld [vmem:[%s1673_s0 + $0x30] sm:$0xff] }
   0x5   :  { %966 = vmatprep.mubr.msk.bf16.mxu0 %vm119_vm1, %v79_v4  ;;  %v51_v16 = vld [vmem:[%s1673_s0 + $0x120] sm:$0xff]  ;;  %v81_v17 = vpack.c.bf16 %v20_v15, %v19_v14  ;;  %v52_v18 = vld [vmem:[%s1673_s0 + $0x128] sm:$0xff]  ;;  %v22_v21 = vld [vmem:[%s1673_s0 + $0x38] sm:$0xff] }
   0x6   :  { %998 = vmatprep.mubr.msk.bf16.mxu1 %vm119_vm1, %v95_v8  ;;  %967 = vmatmul.mubr.msk.bf16.vlgmr.msra.gmra.mxu0 %vm119_vm1, %v80_v12  ;;  %v97_v19 = vpack.c.bf16 %v52_v18, %v51_v16  ;;  %v53_v22 = vld [vmem:[%s1673_s0 + $0x130] sm:$0xff]  ;;  %v54_v23 = vld [vmem:[%s1673_s0 + $0x138] sm:$0xff]  ;;  %v23_v24 = vld [vmem:[%s1673_s0 + $0x40] sm:$0xff]  ;;  %v82_v28 = vpack.c.bf16 %v22_v21, %v21_v20 }
   0x7   :  { %999 = vmatmul.mubr.msk.bf16.vlgmr.msra.gmra.mxu1 %vm119_vm1, %v96_v13  ;;  %970 = vmatprep.mubr.msk.bf16.mxu0 %vm119_vm1, %v81_v17  ;;  %v24_v25 = vld [vmem:[%s1673_s0 + $0x48] sm:$0xff]  ;;  %v55_v26 = vld [vmem:[%s1673_s0 + $0x140] sm:$0xff]  ;;  %v98_v29 = vpack.c.bf16 %v54_v23, %v53_v22  ;;  %v25_v32 = vld [vmem:[%s1673_s0 + $0x50] sm:$0xff] }
   0x8   :  { %1002 = vmatprep.mubr.msk.bf16.mxu1 %vm119_vm1, %v97_v19  ;;  %v56_v27 = vld [vmem:[%s1673_s0 + $0x148] sm:$0xff]  ;;  %v83_v30 = vpack.c.bf16 %v24_v25, %v23_v24  ;;  %v26_v33 = vld [vmem:[%s1673_s0 + $0x58] sm:$0xff]  ;;  %v57_v34 = vld [vmem:[%s1673_s0 + $0x150] sm:$0xff] }
   0x9   :  { %v99_v31 = vpack.c.bf16 %v56_v27, %v55_v26  ;;  %v58_v35 = vld [vmem:[%s1673_s0 + $0x158] sm:$0xff]  ;;  %v27_v36 = vld [vmem:[%s1673_s0 + $0x60] sm:$0xff]  ;;  %v28_v37 = vld [vmem:[%s1673_s0 + $0x68] sm:$0xff]  ;;  %v84_v40 = vpack.c.bf16 %v26_v33, %v25_v32 }
   0xa   :  { %v59_v38 = vld [vmem:[%s1673_s0 + $0x160] sm:$0xff]  ;;  %v60_v39 = vld [vmem:[%s1673_s0 + $0x168] sm:$0xff]  ;;  %v100_v41 = vpack.c.bf16 %v58_v35, %v57_v34  ;;  %v85_v42 = vpack.c.bf16 %v28_v37, %v27_v36  ;;  %v29_v44 = vld [vmem:[%s1673_s0 + $0x70] sm:$0xff] }
   0xb   :  { %v101_v43 = vpack.c.bf16 %v60_v39, %v59_v38  ;;  %v30_v45 = vld [vmem:[%s1673_s0 + $0x78] sm:$0xff]  ;;  %v61_v46 = vld [vmem:[%s1673_s0 + $0x170] sm:$0xff]  ;;  %v31_v48 = vld [vmem:[%s1673_s0 + $0x80] sm:$0xff] }
   0xc   :  { %v62_v47 = vld [vmem:[%s1673_s0 + $0x178] sm:$0xff]  ;;  %v32_v49 = vld [vmem:[%s1673_s0 + $0x88] sm:$0xff]  ;;  %v63_v50 = vld [vmem:[%s1673_s0 + $0x180] sm:$0xff]  ;;  %v86_v52 = vpack.c.bf16 %v30_v45, %v29_v44 }
   0xd   :  { %v64_v51 = vld [vmem:[%s1673_s0 + $0x188] sm:$0xff]  ;;  %v102_v53 = vpack.c.bf16 %v62_v47, %v61_v46  ;;  %v87_v54 = vpack.c.bf16 %v32_v49, %v31_v48  ;;  %v33_v56 = vld [vmem:[%s1673_s0 + $0x90] sm:$0xff]  ;;  %v34_v57 = vld [vmem:[%s1673_s0 + $0x98] sm:$0xff] }
   0xe   :  { %971 = vmatmul.mubr.msk.bf16.gmra.mxu0 %vm119_vm1, %v82_v28  ;;  %v103_v55 = vpack.c.bf16 %v64_v51, %v63_v50  ;;  %v65_v58 = vld [vmem:[%s1673_s0 + $0x190] sm:$0xff]  ;;  %v66_v59 = vld [vmem:[%s1673_s0 + $0x198] sm:$0xff]  ;;  %v35_v60 = vld [vmem:[%s1673_s0 + $0xa0] sm:$0xff]  ;;  %v88_v0 = vpack.c.bf16 %v34_v57, %v33_v56 }
   0xf   :  { %1003 = vmatmul.mubr.msk.bf16.gmra.mxu1 %vm119_vm1, %v98_v29  ;;  %974 = vmatprep.mubr.msk.bf16.mxu0 %vm119_vm1, %v83_v30  ;;  %v36_v61 = vld [vmem:[%s1673_s0 + $0xa8] sm:$0xff]  ;;  %v67_v62 = vld [vmem:[%s1673_s0 + $0x1a0] sm:$0xff]  ;;  %v104_v1 = vpack.c.bf16 %v66_v59, %v65_v58  ;;  %v37_v4 = vld [vmem:[%s1673_s0 + $0xb0] sm:$0xff] }
  0x10   :  { %1006 = vmatprep.mubr.msk.bf16.mxu1 %vm119_vm1, %v99_v31  ;;  %v68_v63 = vld [vmem:[%s1673_s0 + $0x1a8] sm:$0xff]  ;;  %v89_v2 = vpack.c.bf16 %v36_v61, %v35_v60  ;;  %v38_v5 = vld [vmem:[%s1673_s0 + $0xb8] sm:$0xff]  ;;  %v69_v6 = vld [vmem:[%s1673_s0 + $0x1b0] sm:$0xff] }
  0x11   :  { %v105_v3 = vpack.c.bf16 %v68_v63, %v67_v62  ;;  %v70_v7 = vld [vmem:[%s1673_s0 + $0x1b8] sm:$0xff]  ;;  %v39_v8 = vld [vmem:[%s1673_s0 + $0xc0] sm:$0xff]  ;;  %v40_v9 = vld [vmem:[%s1673_s0 + $0xc8] sm:$0xff]  ;;  %v90_v12 = vpack.c.bf16 %v38_v5, %v37_v4 }
  0x12   :  { %v71_v10 = vld [vmem:[%s1673_s0 + $0x1c0] sm:$0xff]  ;;  %v72_v11 = vld [vmem:[%s1673_s0 + $0x1c8] sm:$0xff]  ;;  %v106_v13 = vpack.c.bf16 %v70_v7, %v69_v6  ;;  %v91_v14 = vpack.c.bf16 %v40_v9, %v39_v8  ;;  %v41_v16 = vld [vmem:[%s1673_s0 + $0xd0] sm:$0xff] }
  0x13   :  { %v107_v15 = vpack.c.bf16 %v72_v11, %v71_v10  ;;  %v42_v17 = vld [vmem:[%s1673_s0 + $0xd8] sm:$0xff]  ;;  %v73_v18 = vld [vmem:[%s1673_s0 + $0x1d0] sm:$0xff]  ;;  %v43_v20 = vld [vmem:[%s1673_s0 + $0xe0] sm:$0xff] }
  0x14   :  { %v74_v19 = vld [vmem:[%s1673_s0 + $0x1d8] sm:$0xff]  ;;  %v44_v21 = vld [vmem:[%s1673_s0 + $0xe8] sm:$0xff]  ;;  %v75_v22 = vld [vmem:[%s1673_s0 + $0x1e0] sm:$0xff]  ;;  %v92_v24 = vpack.c.bf16 %v42_v17, %v41_v16 }
  0x15   :  { %v76_v23 = vld [vmem:[%s1673_s0 + $0x1e8] sm:$0xff]  ;;  %v108_v25 = vpack.c.bf16 %v74_v19, %v73_v18  ;;  %v93_v26 = vpack.c.bf16 %v44_v21, %v43_v20  ;;  %v45_v28 = vld [vmem:[%s1673_s0 + $0xf0] sm:$0xff]  ;;  %v46_v29 = vld [vmem:[%s1673_s0 + $0xf8] sm:$0xff] }
  0x16   :  { %975 = vmatmul.mubr.msk.bf16.gmra.mxu0 %vm119_vm1, %v84_v40  ;;  %v109_v27 = vpack.c.bf16 %v76_v23, %v75_v22  ;;  %v77_v30 = vld [vmem:[%s1673_s0 + $0x1f0] sm:$0xff]  ;;  %v78_v31 = vld [vmem:[%s1673_s0 + $0x1f8] sm:$0xff]  ;;  %v94_v32 = vpack.c.bf16 %v46_v29, %v45_v28  ;;  %v1284_v34 = vld [vmem:[%s1674_s2] ss:$0 sm:$0xff] }
  0x17   :  { %1007 = vmatmul.mubr.msk.bf16.gmra.mxu1 %vm119_vm1, %v100_v41  ;;  %978 = vmatprep.mubr.msk.bf16.mxu0 %vm119_vm1, %v85_v42  ;;  %v110_v33 = vpack.c.bf16 %v78_v31, %v77_v30 }
  0x18   :  { %1010 = vmatprep.mubr.msk.bf16.mxu1 %vm119_vm1, %v101_v43 }
  0x1e   :  { %979 = vmatmul.mubr.msk.bf16.gmra.mxu0 %vm119_vm1, %v86_v52 }
  0x1f   :  { %1011 = vmatmul.mubr.msk.bf16.gmra.mxu1 %vm119_vm1, %v102_v53  ;;  %982 = vmatprep.mubr.msk.bf16.mxu0 %vm119_vm1, %v87_v54 }
  0x20   :  { %1014 = vmatprep.mubr.msk.bf16.mxu1 %vm119_vm1, %v103_v55 }
  0x26   :  { %983 = vmatmul.mubr.msk.bf16.gmra.mxu0 %vm119_vm1, %v88_v0 }
  0x27   :  { %1015 = vmatmul.mubr.msk.bf16.gmra.mxu1 %vm119_vm1, %v104_v1  ;;  %986 = vmatprep.mubr.msk.bf16.mxu0 %vm119_vm1, %v89_v2 }
  0x28   :  { %1018 = vmatprep.mubr.msk.bf16.mxu1 %vm119_vm1, %v105_v3 }
  0x2e   :  { %987 = vmatmul.mubr.msk.bf16.gmra.mxu0 %vm119_vm1, %v90_v12 }
  0x2f   :  { %1019 = vmatmul.mubr.msk.bf16.gmra.mxu1 %vm119_vm1, %v106_v13  ;;  %990 = vmatprep.mubr.msk.bf16.mxu0 %vm119_vm1, %v91_v14 }
  0x30   :  { %1022 = vmatprep.mubr.msk.bf16.mxu1 %vm119_vm1, %v107_v15 }
  0x36   :  { %991 = vmatmul.mubr.msk.bf16.gmra.mxu0 %vm119_vm1, %v92_v24 }
  0x37   :  { %1023 = vmatmul.mubr.msk.bf16.gmra.mxu1 %vm119_vm1, %v108_v25  ;;  %994 = vmatprep.mubr.msk.bf16.mxu0 %vm119_vm1, %v93_v26 }
  0x38   :  { %1026 = vmatprep.mubr.msk.bf16.mxu1 %vm119_vm1, %v109_v27 }
  0x3e   :  { %995 = vmatmul.mubr.msk.bf16.gmra.mxu0 %vm119_vm1, %v94_v32 }
  0x3f   :  { %1027 = vmatmul.mubr.msk.bf16.gmra.mxu1 %vm119_vm1, %v110_v33 }
  0xc6   :  { %v968_v35 = vpop.f32.mrf.mxu0 }
  0xc7   :  { %v1000_v36 = vpop.f32.mrf.mxu1  ;;  %v263_v37 = vadd.f32 %v968_v35, %v1284_v34 }
  0xc8   :  { %v391_v38 = vadd.f32 %v1000_v36, %v1284_v34  ;;  %v254_v39 = vpop.f32.mrf.mxu0 }
  0xc9   :  { %v382_v40 = vpop.f32.mrf.mxu1  ;;  %v511_v41 = vadd.f32 3.0, %v263_v37  ;;  %v255_v43 = vadd.f32 %v1284_v34, %v254_v39 }
  0xca   :  { %v543_v42 = vadd.f32 3.0, %v391_v38  ;;  %v383_v44 = vadd.f32 %v1284_v34, %v382_v40  ;;  %v969_v45 = vpop.f32.mrf.mxu0 }
  0xcb   :  { %v1001_v46 = vpop.f32.mrf.mxu1  ;;  %v575_v47 = vmax.f32 %v511_v41, 0.0  ;;  %v509_v49 = vadd.f32 3.0, %v255_v43  ;;  %v266_v51 = vadd.f32 %v969_v45, %v1284_v34 }
  0xcc   :  { %v607_v48 = vmax.f32 %v543_v42, 0.0  ;;  %v541_v50 = vadd.f32 3.0, %v383_v44  ;;  %v394_v52 = vadd.f32 %v1001_v46, %v1284_v34  ;;  %v257_v53 = vpop.f32.mrf.mxu0 }
  0xcd   :  { %v385_v54 = vpop.f32.mrf.mxu1  ;;  %v639_v55 = vmin.f32 %v575_v47, 6.0  ;;  %v573_v57 = vmax.f32 %v509_v49, 0.0  ;;  %v512_v59 = vadd.f32 3.0, %v266_v51  ;;  %v258_v61 = vadd.f32 %v1284_v34, %v257_v53 }
  0xce   :  { %v671_v56 = vmin.f32 %v607_v48, 6.0  ;;  %v605_v58 = vmax.f32 %v541_v50, 0.0  ;;  %v544_v60 = vadd.f32 3.0, %v394_v52  ;;  %v386_v62 = vadd.f32 %v1284_v34, %v385_v54  ;;  %v972_v63 = vpop.f32.mrf.mxu0 }
  0xcf   :  { %v1004_v0 = vpop.f32.mrf.mxu1  ;;  %v703_v1 = vmul.f32 %v639_v55, %v263_v37  ;;  %v637_v3 = vmin.f32 %v573_v57, 6.0  ;;  %v576_v5 = vmax.f32 %v512_v59, 0.0  ;;  %v510_v7 = vadd.f32 3.0, %v258_v61 }
  0xd0   :  { %v735_v2 = vmul.f32 %v671_v56, %v391_v38  ;;  %v669_v4 = vmin.f32 %v605_v58, 6.0  ;;  %v608_v6 = vmax.f32 %v544_v60, 0.0  ;;  %v542_v8 = vadd.f32 3.0, %v386_v62  ;;  %v270_v9 = vpop.f32.mrf.mxu0 }
  0xd1   :  { %v398_v10 = vpop.f32.mrf.mxu1  ;;  %v767_v11 = vmul.f32 0.16666667, %v703_v1  ;;  %v701_v13 = vmul.f32 %v637_v3, %v255_v43  ;;  %v640_v15 = vmin.f32 %v576_v5, 6.0  ;;  %v574_v17 = vmax.f32 %v510_v7, 0.0 }
  0xd2   :  { %v799_v12 = vmul.f32 0.16666667, %v735_v2  ;;  %v733_v14 = vmul.f32 %v669_v4, %v383_v44  ;;  %v672_v16 = vmin.f32 %v608_v6, 6.0  ;;  %v606_v18 = vmax.f32 %v542_v8, 0.0  ;;  %v973_v19 = vpop.f32.mrf.mxu0 }
  0xd3   :  { %v1005_v20 = vpop.f32.mrf.mxu1  ;;  %832 = vst.msk [vmem:[%s1675_s3 + $0x10] sm:$0xff] %vm829_vm2, %v767_v11  ;;  %v765_v21 = vmul.f32 0.16666667, %v701_v13  ;;  %v279_v23 = vadd.f32 %v972_v63, %v1284_v34  ;;  %v407_v24 = vadd.f32 %v1004_v0, %v1284_v34  ;;  %v704_v25 = vmul.f32 %v640_v15, %v266_v51 }
  0xd4   :  { %864 = vst.msk [vmem:[%s1675_s3 + $0x110] sm:$0xff] %vm829_vm2, %v799_v12  ;;  %v797_v22 = vmul.f32 0.16666667, %v733_v14  ;;  %v736_v26 = vmul.f32 %v672_v16, %v394_v52  ;;  %v638_v27 = vmin.f32 %v574_v17, 6.0  ;;  %v670_v28 = vmin.f32 %v606_v18, 6.0  ;;  %v273_v29 = vpop.f32.mrf.mxu0 }
  0xd5   :  { %v401_v30 = vpop.f32.mrf.mxu1  ;;  %830 = vst.msk [vmem:[%s1675_s3] sm:$0xff] %vm829_vm2, %v765_v21  ;;  %v515_v31 = vadd.f32 3.0, %v279_v23  ;;  %v547_v32 = vadd.f32 3.0, %v407_v24  ;;  %v271_v33 = vadd.f32 %v1284_v34, %v270_v9  ;;  %v399_v35 = vadd.f32 %v1284_v34, %v398_v10 }
  0xd6   :  { %862 = vst.msk [vmem:[%s1675_s3 + $0x100] sm:$0xff] %vm829_vm2, %v797_v22  ;;  %v768_v36 = vmul.f32 0.16666667, %v704_v25  ;;  %v800_v37 = vmul.f32 0.16666667, %v736_v26  ;;  %v702_v38 = vmul.f32 %v638_v27, %v258_v61  ;;  %v734_v39 = vmul.f32 %v670_v28, %v386_v62  ;;  %v976_v40 = vpop.f32.mrf.mxu0 }
  0xd7   :  { %v1008_v41 = vpop.f32.mrf.mxu1  ;;  %v579_v42 = vmax.f32 %v515_v31, 0.0  ;;  %v611_v43 = vmax.f32 %v547_v32, 0.0  ;;  %v513_v44 = vadd.f32 3.0, %v271_v33  ;;  %v545_v45 = vadd.f32 3.0, %v399_v35 }
  0xd8   :  { %833 = vst.msk [vmem:[%s1675_s3 + $0x18] sm:$0xff] %vm829_vm2, %v768_v36  ;;  %865 = vst.msk [vmem:[%s1675_s3 + $0x118] sm:$0xff] %vm829_vm2, %v800_v37  ;;  %v766_v46 = vmul.f32 0.16666667, %v702_v38  ;;  %v798_v47 = vmul.f32 0.16666667, %v734_v39  ;;  %v282_v48 = vadd.f32 %v973_v19, %v1284_v34  ;;  %v410_v49 = vadd.f32 %v1005_v20, %v1284_v34  ;;  %v286_v50 = vpop.f32.mrf.mxu0 }
  0xd9   :  { %v414_v51 = vpop.f32.mrf.mxu1  ;;  %v643_v52 = vmin.f32 %v579_v42, 6.0  ;;  %v675_v53 = vmin.f32 %v611_v43, 6.0  ;;  %v577_v54 = vmax.f32 %v513_v44, 0.0  ;;  %v609_v55 = vmax.f32 %v545_v45, 0.0 }
  0xda   :  { %831 = vst.msk [vmem:[%s1675_s3 + $0x8] sm:$0xff] %vm829_vm2, %v766_v46  ;;  %863 = vst.msk [vmem:[%s1675_s3 + $0x108] sm:$0xff] %vm829_vm2, %v798_v47  ;;  %v516_v56 = vadd.f32 3.0, %v282_v48  ;;  %v548_v57 = vadd.f32 3.0, %v410_v49  ;;  %v274_v58 = vadd.f32 %v1284_v34, %v273_v29  ;;  %v402_v59 = vadd.f32 %v1284_v34, %v401_v30  ;;  %v977_v60 = vpop.f32.mrf.mxu0 }
  0xdb   :  { %v1009_v61 = vpop.f32.mrf.mxu1  ;;  %v707_v62 = vmul.f32 %v643_v52, %v279_v23  ;;  %v739_v63 = vmul.f32 %v675_v53, %v407_v24  ;;  %v641_v0 = vmin.f32 %v577_v54, 6.0  ;;  %v673_v1 = vmin.f32 %v609_v55, 6.0 }
  0xdc   :  { %v580_v2 = vmax.f32 %v516_v56, 0.0  ;;  %v612_v3 = vmax.f32 %v548_v57, 0.0  ;;  %v514_v4 = vadd.f32 3.0, %v274_v58  ;;  %v546_v5 = vadd.f32 3.0, %v402_v59  ;;  %v289_v6 = vpop.f32.mrf.mxu0 }
  0xdd   :  { %v417_v7 = vpop.f32.mrf.mxu1  ;;  %v771_v8 = vmul.f32 0.16666667, %v707_v62  ;;  %v803_v9 = vmul.f32 0.16666667, %v739_v63  ;;  %v705_v10 = vmul.f32 %v641_v0, %v271_v33  ;;  %v737_v11 = vmul.f32 %v673_v1, %v399_v35 }
  0xde   :  { %v644_v12 = vmin.f32 %v580_v2, 6.0  ;;  %v676_v13 = vmin.f32 %v612_v3, 6.0  ;;  %v578_v14 = vmax.f32 %v514_v4, 0.0  ;;  %v610_v15 = vmax.f32 %v546_v5, 0.0  ;;  %v1334_v16 = vpop.f32.mrf.mxu0 }
  0xdf   :  { %v1336_v17 = vpop.f32.mrf.mxu1  ;;  %836 = vst.msk [vmem:[%s1675_s3 + $0x30] sm:$0xff] %vm829_vm2, %v771_v8  ;;  %868 = vst.msk [vmem:[%s1675_s3 + $0x130] sm:$0xff] %vm829_vm2, %v803_v9  ;;  %v769_v18 = vmul.f32 0.16666667, %v705_v10  ;;  %v801_v19 = vmul.f32 0.16666667, %v737_v11  ;;  %v295_v20 = vadd.f32 %v976_v40, %v1284_v34  ;;  %v423_v21 = vadd.f32 %v1008_v41, %v1284_v34 }
  0xe0   :  { %v708_v22 = vmul.f32 %v644_v12, %v282_v48  ;;  %v740_v23 = vmul.f32 %v676_v13, %v410_v49  ;;  %v642_v24 = vmin.f32 %v578_v14, 6.0  ;;  %v674_v25 = vmin.f32 %v610_v15, 6.0  ;;  %v1348_v26 = vpop.f32.mrf.mxu0 }
  0xe1   :  { %v1350_v27 = vpop.f32.mrf.mxu1  ;;  %834 = vst.msk [vmem:[%s1675_s3 + $0x20] sm:$0xff] %vm829_vm2, %v769_v18  ;;  %866 = vst.msk [vmem:[%s1675_s3 + $0x120] sm:$0xff] %vm829_vm2, %v801_v19  ;;  %v519_v28 = vadd.f32 3.0, %v295_v20  ;;  %v551_v29 = vadd.f32 3.0, %v423_v21  ;;  %v287_v30 = vadd.f32 %v1284_v34, %v286_v50  ;;  %v415_v31 = vadd.f32 %v1284_v34, %v414_v51 }
  0xe2   :  { %v772_v32 = vmul.f32 0.16666667, %v708_v22  ;;  %v804_v33 = vmul.f32 0.16666667, %v740_v23  ;;  %v706_v35 = vmul.f32 %v642_v24, %v274_v58  ;;  %v738_v36 = vmul.f32 %v674_v25, %v402_v59  ;;  %v1362_v37 = vpop.f32.mrf.mxu0 }
  0xe3   :  { %v1364_v38 = vpop.f32.mrf.mxu1  ;;  %v583_v39 = vmax.f32 %v519_v28, 0.0  ;;  %v615_v40 = vmax.f32 %v551_v29, 0.0  ;;  %v517_v41 = vadd.f32 3.0, %v287_v30  ;;  %v549_v42 = vadd.f32 3.0, %v415_v31 }
  0xe4   :  { %837 = vst.msk [vmem:[%s1675_s3 + $0x38] sm:$0xff] %vm829_vm2, %v772_v32  ;;  %869 = vst.msk [vmem:[%s1675_s3 + $0x138] sm:$0xff] %vm829_vm2, %v804_v33  ;;  %v770_v43 = vmul.f32 0.16666667, %v706_v35  ;;  %v802_v44 = vmul.f32 0.16666667, %v738_v36  ;;  %v298_v45 = vadd.f32 %v977_v60, %v1284_v34  ;;  %v426_v46 = vadd.f32 %v1009_v61, %v1284_v34  ;;  %v1376_v47 = vpop.f32.mrf.mxu0 }
  0xe5   :  { %v1378_v48 = vpop.f32.mrf.mxu1  ;;  %v647_v49 = vmin.f32 %v583_v39, 6.0  ;;  %v679_v50 = vmin.f32 %v615_v40, 6.0  ;;  %v581_v51 = vmax.f32 %v517_v41, 0.0  ;;  %v613_v52 = vmax.f32 %v549_v42, 0.0 }
  0xe6   :  { %835 = vst.msk [vmem:[%s1675_s3 + $0x28] sm:$0xff] %vm829_vm2, %v770_v43  ;;  %867 = vst.msk [vmem:[%s1675_s3 + $0x128] sm:$0xff] %vm829_vm2, %v802_v44  ;;  %v520_v53 = vadd.f32 3.0, %v298_v45  ;;  %v552_v54 = vadd.f32 3.0, %v426_v46  ;;  %v290_v55 = vadd.f32 %v1284_v34, %v289_v6  ;;  %v418_v56 = vadd.f32 %v1284_v34, %v417_v7  ;;  %v1390_v57 = vpop.f32.mrf.mxu0 }
  0xe7   :  { %v1392_v58 = vpop.f32.mrf.mxu1  ;;  %v711_v59 = vmul.f32 %v647_v49, %v295_v20  ;;  %v743_v60 = vmul.f32 %v679_v50, %v423_v21  ;;  %v645_v61 = vmin.f32 %v581_v51, 6.0  ;;  %v677_v62 = vmin.f32 %v613_v52, 6.0 }
  0xe8   :  { %v584_v63 = vmax.f32 %v520_v53, 0.0  ;;  %v616_v0 = vmax.f32 %v552_v54, 0.0  ;;  %v518_v1 = vadd.f32 3.0, %v290_v55  ;;  %v550_v2 = vadd.f32 3.0, %v418_v56  ;;  %v1394_v3 = vpop.f32.mrf.mxu0 }
  0xe9   :  { %v1396_v4 = vpop.f32.mrf.mxu1  ;;  %v775_v5 = vmul.f32 0.16666667, %v711_v59  ;;  %v807_v6 = vmul.f32 0.16666667, %v743_v60  ;;  %v709_v8 = vmul.f32 %v645_v61, %v287_v30  ;;  %v741_v7 = vmul.f32 %v677_v62, %v415_v31 }
  0xea   :  { %v648_v9 = vmin.f32 %v584_v63, 6.0  ;;  %v680_v10 = vmin.f32 %v616_v0, 6.0  ;;  %v582_v11 = vmax.f32 %v518_v1, 0.0  ;;  %v614_v12 = vmax.f32 %v550_v2, 0.0  ;;  %v1410_v19 = vpop.f32.mrf.mxu0 }
  0xeb   :  { %840 = vst.msk [vmem:[%s1675_s3 + $0x50] sm:$0xff] %vm829_vm2, %v775_v5  ;;  %872 = vst.msk [vmem:[%s1675_s3 + $0x150] sm:$0xff] %vm829_vm2, %v807_v6  ;;  %v773_v13 = vmul.f32 0.16666667, %v709_v8  ;;  %v805_v14 = vmul.f32 0.16666667, %v741_v7  ;;  %v311_v15 = vadd.f32 %v1334_v16, %v1284_v34  ;;  %v439_v18 = vadd.f32 %v1336_v17, %v1284_v34  ;;  %v1412_v20 = vpop.f32.mrf.mxu1 }
  0xec   :  { %v712_v21 = vmul.f32 %v648_v9, %v298_v45  ;;  %v744_v22 = vmul.f32 %v680_v10, %v426_v46  ;;  %v646_v23 = vmin.f32 %v582_v11, 6.0  ;;  %v678_v24 = vmin.f32 %v614_v12, 6.0  ;;  %v1426_v40 = vpop.f32.mrf.mxu0 }
  0xed   :  { %838 = vst.msk [vmem:[%s1675_s3 + $0x40] sm:$0xff] %vm829_vm2, %v773_v13  ;;  %870 = vst.msk [vmem:[%s1675_s3 + $0x140] sm:$0xff] %vm829_vm2, %v805_v14  ;;  %v523_v16 = vadd.f32 3.0, %v311_v15  ;;  %v555_v17 = vadd.f32 3.0, %v439_v18  ;;  %v303_v25 = vadd.f32 %v1284_v34, %v1348_v26  ;;  %v431_v28 = vadd.f32 %v1284_v34, %v1350_v27  ;;  %v1428_v41 = vpop.f32.mrf.mxu1 }
  0xee   :  { %v776_v29 = vmul.f32 0.16666667, %v712_v21  ;;  %v808_v30 = vmul.f32 0.16666667, %v744_v22  ;;  %v710_v31 = vmul.f32 %v646_v23, %v290_v55  ;;  %v742_v32 = vmul.f32 %v678_v24, %v418_v56  ;;  %v1454_v56 = vpop.f32.mrf.mxu0 }
  0xef   :  { %v587_v33 = vmax.f32 %v523_v16, 0.0  ;;  %v619_v35 = vmax.f32 %v555_v17, 0.0  ;;  %v521_v36 = vadd.f32 3.0, %v303_v25  ;;  %v553_v39 = vadd.f32 3.0, %v431_v28  ;;  %v1456_v59 = vpop.f32.mrf.mxu1 }
  0xf0   :  { %841 = vst.msk [vmem:[%s1675_s3 + $0x58] sm:$0xff] %vm829_vm2, %v776_v29  ;;  %873 = vst.msk [vmem:[%s1675_s3 + $0x158] sm:$0xff] %vm829_vm2, %v808_v30  ;;  %v774_v26 = vmul.f32 0.16666667, %v710_v31  ;;  %v806_v27 = vmul.f32 0.16666667, %v742_v32  ;;  %v314_v42 = vadd.f32 %v1362_v37, %v1284_v34  ;;  %v442_v43 = vadd.f32 %v1364_v38, %v1284_v34  ;;  %v1470_v12 = vpop.f32.mrf.mxu0 }
  0xf1   :  { %v651_v44 = vmin.f32 %v587_v33, 6.0  ;;  %v683_v45 = vmin.f32 %v619_v35, 6.0  ;;  %v585_v46 = vmax.f32 %v521_v36, 0.0  ;;  %v617_v49 = vmax.f32 %v553_v39, 0.0  ;;  %v1472_v13 = vpop.f32.mrf.mxu1 }
  0xf2   :  { %839 = vst.msk [vmem:[%s1675_s3 + $0x48] sm:$0xff] %vm829_vm2, %v774_v26  ;;  %871 = vst.msk [vmem:[%s1675_s3 + $0x148] sm:$0xff] %vm829_vm2, %v806_v27  ;;  %v524_v50 = vadd.f32 3.0, %v314_v42  ;;  %v556_v51 = vadd.f32 3.0, %v442_v43  ;;  %v306_v37 = vadd.f32 %v1284_v34, %v1376_v47  ;;  %v434_v38 = vadd.f32 %v1284_v34, %v1378_v48  ;;  %v1486_v32 = vpop.f32.mrf.mxu0 }
  0xf3   :  { %v715_v52 = vmul.f32 %v651_v44, %v311_v15  ;;  %v747_v53 = vmul.f32 %v683_v45, %v439_v18  ;;  %v649_v54 = vmin.f32 %v585_v46, 6.0  ;;  %v681_v55 = vmin.f32 %v617_v49, 6.0  ;;  %v1488_v33 = vpop.f32.mrf.mxu1 }
  0xf4   :  { %v588_v60 = vmax.f32 %v524_v50, 0.0  ;;  %v620_v61 = vmax.f32 %v556_v51, 0.0  ;;  %v522_v62 = vadd.f32 3.0, %v306_v37  ;;  %v554_v63 = vadd.f32 3.0, %v434_v38  ;;  %v337_v51 = vpop.f32.mrf.mxu0 }
  0xf5   :  { %v779_v0 = vmul.f32 0.16666667, %v715_v52  ;;  %v811_v1 = vmul.f32 0.16666667, %v747_v53  ;;  %v713_v2 = vmul.f32 %v649_v54, %v303_v25  ;;  %v745_v5 = vmul.f32 %v681_v55, %v431_v28 }
  0xf6   :  { %v652_v47 = vmin.f32 %v588_v60, 6.0  ;;  %v684_v6 = vmin.f32 %v620_v61, 6.0  ;;  %v586_v8 = vmax.f32 %v522_v62, 0.0  ;;  %v618_v48 = vmax.f32 %v554_v63, 0.0 }
  0xf7   :  { %844 = vst.msk [vmem:[%s1675_s3 + $0x70] sm:$0xff] %vm829_vm2, %v779_v0  ;;  %876 = vst.msk [vmem:[%s1675_s3 + $0x170] sm:$0xff] %vm829_vm2, %v811_v1  ;;  %v777_v7 = vmul.f32 0.16666667, %v713_v2  ;;  %v809_v9 = vmul.f32 0.16666667, %v745_v5  ;;  %v327_v10 = vadd.f32 %v1390_v57, %v1284_v34  ;;  %v455_v11 = vadd.f32 %v1392_v58, %v1284_v34 }
  0xf8   :  { %v716_v14 = vmul.f32 %v652_v47, %v314_v42  ;;  %v748_v15 = vmul.f32 %v684_v6, %v442_v43  ;;  %v650_v18 = vmin.f32 %v586_v8, 6.0  ;;  %v682_v21 = vmin.f32 %v618_v48, 6.0  ;;  %v992_v6 = vpop.f32.mrf.mxu0 }
  0xf9   :  { %842 = vst.msk [vmem:[%s1675_s3 + $0x60] sm:$0xff] %vm829_vm2, %v777_v7  ;;  %874 = vst.msk [vmem:[%s1675_s3 + $0x160] sm:$0xff] %vm829_vm2, %v809_v9  ;;  %v527_v57 = vadd.f32 3.0, %v327_v10  ;;  %v559_v58 = vadd.f32 3.0, %v455_v11  ;;  %v319_v22 = vadd.f32 %v1284_v34, %v1394_v3  ;;  %v447_v23 = vadd.f32 %v1284_v34, %v1396_v4 }
  0xfa   :  { %v780_v24 = vmul.f32 0.16666667, %v716_v14  ;;  %v812_v16 = vmul.f32 0.16666667, %v748_v15  ;;  %v714_v17 = vmul.f32 %v650_v18, %v306_v37  ;;  %v746_v25 = vmul.f32 %v682_v21, %v434_v38  ;;  %v465_v37 = vpop.f32.mrf.mxu1 }
  0xfb   :  { %v591_v28 = vmax.f32 %v527_v57, 0.0  ;;  %v623_v29 = vmax.f32 %v559_v58, 0.0  ;;  %v525_v30 = vadd.f32 3.0, %v319_v22  ;;  %v557_v31 = vadd.f32 3.0, %v447_v23 }
  0xfc   :  { %845 = vst.msk [vmem:[%s1675_s3 + $0x78] sm:$0xff] %vm829_vm2, %v780_v24  ;;  %877 = vst.msk [vmem:[%s1675_s3 + $0x178] sm:$0xff] %vm829_vm2, %v812_v16  ;;  %v778_v3 = vmul.f32 0.16666667, %v714_v17  ;;  %v810_v4 = vmul.f32 0.16666667, %v746_v25  ;;  %v330_v35 = vadd.f32 %v1410_v19, %v1284_v34  ;;  %v458_v36 = vadd.f32 %v1412_v20, %v1284_v34  ;;  %v1024_v8 = vpop.f32.mrf.mxu1  ;;  %v350_v16 = vpop.f32.mrf.mxu0 }
  0xfd   :  { %v655_v39 = vmin.f32 %v591_v28, 6.0  ;;  %v687_v26 = vmin.f32 %v623_v29, 6.0  ;;  %v589_v27 = vmax.f32 %v525_v30, 0.0  ;;  %v621_v42 = vmax.f32 %v557_v31, 0.0 }
  0xfe   :  { %843 = vst.msk [vmem:[%s1675_s3 + $0x68] sm:$0xff] %vm829_vm2, %v778_v3  ;;  %875 = vst.msk [vmem:[%s1675_s3 + $0x168] sm:$0xff] %vm829_vm2, %v810_v4  ;;  %v528_v43 = vadd.f32 3.0, %v330_v35  ;;  %v560_v44 = vadd.f32 3.0, %v458_v36  ;;  %v322_v19 = vadd.f32 %v1284_v34, %v1426_v40  ;;  %v450_v20 = vadd.f32 %v1284_v34, %v1428_v41  ;;  %v478_v17 = vpop.f32.mrf.mxu1 }
  0xff   :  { %v719_v45 = vmul.f32 %v655_v39, %v327_v10  ;;  %v751_v46 = vmul.f32 %v687_v26, %v455_v11  ;;  %v653_v49 = vmin.f32 %v589_v27, 6.0  ;;  %v685_v50 = vmin.f32 %v621_v42, 6.0  ;;  %v993_v42 = vpop.f32.mrf.mxu0 }
 0x100   :  { %v592_v38 = vmax.f32 %v528_v43, 0.0  ;;  %v624_v52 = vmax.f32 %v560_v44, 0.0  ;;  %v526_v53 = vadd.f32 3.0, %v322_v19  ;;  %v558_v54 = vadd.f32 3.0, %v450_v20  ;;  %v1025_v43 = vpop.f32.mrf.mxu1 }
 0x101   :  { %v783_v55 = vmul.f32 0.16666667, %v719_v45  ;;  %v815_v60 = vmul.f32 0.16666667, %v751_v46  ;;  %v717_v61 = vmul.f32 %v653_v49, %v319_v22  ;;  %v749_v62 = vmul.f32 %v685_v50, %v447_v23 }
 0x102   :  { %v656_v63 = vmin.f32 %v592_v38, 6.0  ;;  %v688_v0 = vmin.f32 %v624_v52, 6.0  ;;  %v590_v40 = vmax.f32 %v526_v53, 0.0  ;;  %v622_v1 = vmax.f32 %v558_v54, 0.0 }
 0x103   :  { %848 = vst.msk [vmem:[%s1675_s3 + $0x90] sm:$0xff] %vm829_vm2, %v783_v55  ;;  %880 = vst.msk [vmem:[%s1675_s3 + $0x190] sm:$0xff] %vm829_vm2, %v815_v60  ;;  %v781_v41 = vmul.f32 0.16666667, %v717_v61  ;;  %v813_v2 = vmul.f32 0.16666667, %v749_v62  ;;  %v343_v5 = vadd.f32 %v1454_v56, %v1284_v34  ;;  %v471_v47 = vadd.f32 %v1456_v59, %v1284_v34  ;;  %v353_v62 = vpop.f32.mrf.mxu0 }
 0x104   :  { %v720_v48 = vmul.f32 %v656_v63, %v330_v35  ;;  %v752_v7 = vmul.f32 %v688_v0, %v458_v36  ;;  %v654_v9 = vmin.f32 %v590_v40, 6.0  ;;  %v686_v10 = vmin.f32 %v622_v1, 6.0  ;;  %v481_v63 = vpop.f32.mrf.mxu1 }
 0x105   :  { %846 = vst.msk [vmem:[%s1675_s3 + $0x80] sm:$0xff] %vm829_vm2, %v781_v41  ;;  %878 = vst.msk [vmem:[%s1675_s3 + $0x180] sm:$0xff] %vm829_vm2, %v813_v2  ;;  %v531_v56 = vadd.f32 3.0, %v343_v5  ;;  %v563_v11 = vadd.f32 3.0, %v471_v47  ;;  %v335_v59 = vadd.f32 %v1284_v34, %v1470_v12  ;;  %v463_v14 = vadd.f32 %v1284_v34, %v1472_v13 }
 0x106   :  { %v784_v15 = vmul.f32 0.16666667, %v720_v48  ;;  %v816_v18 = vmul.f32 0.16666667, %v752_v7  ;;  %v718_v21 = vmul.f32 %v654_v9, %v322_v19  ;;  %v750_v57 = vmul.f32 %v686_v10, %v450_v20 }
 0x107   :  { %v595_v58 = vmax.f32 %v531_v56, 0.0  ;;  %v627_v22 = vmax.f32 %v563_v11, 0.0  ;;  %v529_v23 = vadd.f32 3.0, %v335_v59  ;;  %v561_v24 = vadd.f32 3.0, %v463_v14 }
 0x108   :  { %849 = vst.msk [vmem:[%s1675_s3 + $0x98] sm:$0xff] %vm829_vm2, %v784_v15  ;;  %881 = vst.msk [vmem:[%s1675_s3 + $0x198] sm:$0xff] %vm829_vm2, %v816_v18  ;;  %v782_v12 = vmul.f32 0.16666667, %v718_v21  ;;  %v814_v13 = vmul.f32 0.16666667, %v750_v57  ;;  %v346_v25 = vadd.f32 %v1486_v32, %v1284_v34  ;;  %v474_v28 = vadd.f32 %v1488_v33, %v1284_v34  ;;  %v1028_v15 = vpop.f32.mrf.mxu1 }
 0x109   :  { %v659_v29 = vmin.f32 %v595_v58, 6.0  ;;  %v691_v30 = vmin.f32 %v627_v22, 6.0  ;;  %v593_v31 = vmax.f32 %v529_v23, 0.0  ;;  %v625_v3 = vmax.f32 %v561_v24, 0.0 }
 0x10a   :  { %847 = vst.msk [vmem:[%s1675_s3 + $0x88] sm:$0xff] %vm829_vm2, %v782_v12  ;;  %879 = vst.msk [vmem:[%s1675_s3 + $0x188] sm:$0xff] %vm829_vm2, %v814_v13  ;;  %v532_v4 = vadd.f32 3.0, %v346_v25  ;;  %v564_v35 = vadd.f32 3.0, %v474_v28  ;;  %v338_v32 = vadd.f32 %v1284_v34, %v337_v51  ;;  %v466_v33 = vadd.f32 %v1284_v34, %v465_v37 }
 0x10b   :  { %v723_v36 = vmul.f32 %v659_v29, %v343_v5  ;;  %v755_v39 = vmul.f32 %v691_v30, %v471_v47  ;;  %v657_v26 = vmin.f32 %v593_v31, 6.0  ;;  %v689_v27 = vmin.f32 %v625_v3, 6.0 }
 0x10c   :  { %v596_v44 = vmax.f32 %v532_v4, 0.0  ;;  %v628_v19 = vmax.f32 %v564_v35, 0.0  ;;  %v530_v20 = vadd.f32 3.0, %v338_v32  ;;  %v562_v45 = vadd.f32 3.0, %v466_v33  ;;  %v494_v4 = vpop.f32.mrf.mxu1 }
 0x10d   :  { %v787_v46 = vmul.f32 0.16666667, %v723_v36  ;;  %v819_v49 = vmul.f32 0.16666667, %v755_v39  ;;  %v721_v50 = vmul.f32 %v657_v26, %v335_v59  ;;  %v753_v38 = vmul.f32 %v689_v27, %v463_v14  ;;  %v996_v14 = vpop.f32.mrf.mxu0 }
 0x10e   :  { %v660_v52 = vmin.f32 %v596_v44, 6.0  ;;  %v692_v53 = vmin.f32 %v628_v19, 6.0  ;;  %v594_v54 = vmax.f32 %v530_v20, 0.0  ;;  %v626_v51 = vmax.f32 %v562_v45, 0.0 }
 0x10f   :  { %852 = vst.msk [vmem:[%s1675_s3 + $0xb0] sm:$0xff] %vm829_vm2, %v787_v46  ;;  %884 = vst.msk [vmem:[%s1675_s3 + $0x1b0] sm:$0xff] %vm829_vm2, %v819_v49  ;;  %v785_v37 = vmul.f32 0.16666667, %v721_v50  ;;  %v817_v55 = vmul.f32 0.16666667, %v753_v38  ;;  %v359_v60 = vadd.f32 %v992_v6, %v1284_v34  ;;  %v487_v61 = vadd.f32 %v1024_v8, %v1284_v34  ;;  %v366_v3 = vpop.f32.mrf.mxu0 }
 0x110   :  { %v724_v0 = vmul.f32 %v660_v52, %v346_v25  ;;  %v756_v40 = vmul.f32 %v692_v53, %v474_v28  ;;  %v658_v1 = vmin.f32 %v594_v54, 6.0  ;;  %v690_v41 = vmin.f32 %v626_v51, 6.0  ;;  %v1029_v52 = vpop.f32.mrf.mxu1 }
 0x111   :  { %850 = vst.msk [vmem:[%s1675_s3 + $0xa0] sm:$0xff] %vm829_vm2, %v785_v37  ;;  %882 = vst.msk [vmem:[%s1675_s3 + $0x1a0] sm:$0xff] %vm829_vm2, %v817_v55  ;;  %v535_v2 = vadd.f32 3.0, %v359_v60  ;;  %v567_v5 = vadd.f32 3.0, %v487_v61  ;;  %v351_v47 = vadd.f32 %v1284_v34, %v350_v16  ;;  %v479_v6 = vadd.f32 %v1284_v34, %v478_v17  ;;  %v997_v38 = vpop.f32.mrf.mxu0 }
 0x112   :  { %v788_v8 = vmul.f32 0.16666667, %v724_v0  ;;  %v820_v48 = vmul.f32 0.16666667, %v756_v40  ;;  %v722_v7 = vmul.f32 %v658_v1, %v338_v32  ;;  %v754_v9 = vmul.f32 %v690_v41, %v466_v33 }
 0x113   :  { %v599_v10 = vmax.f32 %v535_v2, 0.0  ;;  %v631_v56 = vmax.f32 %v567_v5, 0.0  ;;  %v533_v11 = vadd.f32 3.0, %v351_v47  ;;  %v565_v59 = vadd.f32 3.0, %v479_v6 }
 0x114   :  { %853 = vst.msk [vmem:[%s1675_s3 + $0xb8] sm:$0xff] %vm829_vm2, %v788_v8  ;;  %885 = vst.msk [vmem:[%s1675_s3 + $0x1b8] sm:$0xff] %vm829_vm2, %v820_v48  ;;  %v786_v18 = vmul.f32 0.16666667, %v722_v7  ;;  %v818_v21 = vmul.f32 0.16666667, %v754_v9  ;;  %v362_v57 = vadd.f32 %v993_v42, %v1284_v34  ;;  %v490_v58 = vadd.f32 %v1025_v43, %v1284_v34  ;;  %v497_v8 = vpop.f32.mrf.mxu1 }
 0x115   :  { %v663_v22 = vmin.f32 %v599_v10, 6.0  ;;  %v695_v23 = vmin.f32 %v631_v56, 6.0  ;;  %v597_v24 = vmax.f32 %v533_v11, 0.0  ;;  %v629_v16 = vmax.f32 %v565_v59, 0.0 }
 0x116   :  { %851 = vst.msk [vmem:[%s1675_s3 + $0xa8] sm:$0xff] %vm829_vm2, %v786_v18  ;;  %883 = vst.msk [vmem:[%s1675_s3 + $0x1a8] sm:$0xff] %vm829_vm2, %v818_v21  ;;  %v536_v17 = vadd.f32 3.0, %v362_v57  ;;  %v568_v12 = vadd.f32 3.0, %v490_v58  ;;  %v354_v13 = vadd.f32 %v1284_v34, %v353_v62  ;;  %v482_v25 = vadd.f32 %v1284_v34, %v481_v63 }
 0x117   :  { %v727_v28 = vmul.f32 %v663_v22, %v359_v60  ;;  %v759_v29 = vmul.f32 %v695_v23, %v487_v61  ;;  %v661_v30 = vmin.f32 %v597_v24, 6.0  ;;  %v693_v31 = vmin.f32 %v629_v16, 6.0 }
 0x118   :  { %v600_v35 = vmax.f32 %v536_v17, 0.0  ;;  %v632_v32 = vmax.f32 %v568_v12, 0.0  ;;  %v534_v33 = vadd.f32 3.0, %v354_v13  ;;  %v566_v36 = vadd.f32 3.0, %v482_v25 }
 0x119   :  { %v791_v39 = vmul.f32 0.16666667, %v727_v28  ;;  %v823_v26 = vmul.f32 0.16666667, %v759_v29  ;;  %v725_v27 = vmul.f32 %v661_v30, %v351_v47  ;;  %v757_v42 = vmul.f32 %v693_v31, %v479_v6  ;;  %v369_v6 = vpop.f32.mrf.mxu0 }
 0x11a   :  { %v664_v43 = vmin.f32 %v600_v35, 6.0  ;;  %v696_v44 = vmin.f32 %v632_v32, 6.0  ;;  %v598_v19 = vmax.f32 %v534_v33, 0.0  ;;  %v630_v20 = vmax.f32 %v566_v36, 0.0 }
 0x11b   :  { %856 = vst.msk [vmem:[%s1675_s3 + $0xd0] sm:$0xff] %vm829_vm2, %v791_v39  ;;  %888 = vst.msk [vmem:[%s1675_s3 + $0x1d0] sm:$0xff] %vm829_vm2, %v823_v26  ;;  %v789_v45 = vmul.f32 0.16666667, %v725_v27  ;;  %v821_v46 = vmul.f32 0.16666667, %v757_v42  ;;  %v375_v49 = vadd.f32 %v996_v14, %v1284_v34  ;;  %v503_v50 = vadd.f32 %v1028_v15, %v1284_v34 }
 0x11c   :  { %v728_v53 = vmul.f32 %v664_v43, %v362_v57  ;;  %v760_v54 = vmul.f32 %v696_v44, %v490_v58  ;;  %v662_v51 = vmin.f32 %v598_v19, 6.0  ;;  %v694_v37 = vmin.f32 %v630_v20, 6.0 }
 0x11d   :  { %854 = vst.msk [vmem:[%s1675_s3 + $0xc0] sm:$0xff] %vm829_vm2, %v789_v45  ;;  %886 = vst.msk [vmem:[%s1675_s3 + $0x1c0] sm:$0xff] %vm829_vm2, %v821_v46  ;;  %v539_v55 = vadd.f32 3.0, %v375_v49  ;;  %v571_v60 = vadd.f32 3.0, %v503_v50  ;;  %v367_v61 = vadd.f32 %v1284_v34, %v366_v3  ;;  %v495_v62 = vadd.f32 %v1284_v34, %v494_v4 }
 0x11e   :  { %v792_v63 = vmul.f32 0.16666667, %v728_v53  ;;  %v824_v0 = vmul.f32 0.16666667, %v760_v54  ;;  %v726_v40 = vmul.f32 %v662_v51, %v354_v13  ;;  %v758_v1 = vmul.f32 %v694_v37, %v482_v25 }
 0x11f   :  { %v603_v41 = vmax.f32 %v539_v55, 0.0  ;;  %v635_v2 = vmax.f32 %v571_v60, 0.0  ;;  %v537_v5 = vadd.f32 3.0, %v367_v61  ;;  %v569_v47 = vadd.f32 3.0, %v495_v62 }
 0x120   :  { %857 = vst.msk [vmem:[%s1675_s3 + $0xd8] sm:$0xff] %vm829_vm2, %v792_v63  ;;  %889 = vst.msk [vmem:[%s1675_s3 + $0x1d8] sm:$0xff] %vm829_vm2, %v824_v0  ;;  %v790_v48 = vmul.f32 0.16666667, %v726_v40  ;;  %v822_v7 = vmul.f32 0.16666667, %v758_v1  ;;  %v378_v9 = vadd.f32 %v997_v38, %v1284_v34  ;;  %v506_v10 = vadd.f32 %v1029_v52, %v1284_v34 }
 0x121   :  { %v667_v56 = vmin.f32 %v603_v41, 6.0  ;;  %v699_v11 = vmin.f32 %v635_v2, 6.0  ;;  %v601_v59 = vmax.f32 %v537_v5, 0.0  ;;  %v633_v14 = vmax.f32 %v569_v47, 0.0 }
 0x122   :  { %855 = vst.msk [vmem:[%s1675_s3 + $0xc8] sm:$0xff] %vm829_vm2, %v790_v48  ;;  %887 = vst.msk [vmem:[%s1675_s3 + $0x1c8] sm:$0xff] %vm829_vm2, %v822_v7  ;;  %v540_v15 = vadd.f32 3.0, %v378_v9  ;;  %v572_v18 = vadd.f32 3.0, %v506_v10  ;;  %v370_v21 = vadd.f32 %v1284_v34, %v369_v6  ;;  %v498_v57 = vadd.f32 %v1284_v34, %v497_v8 }
 0x123   :  { %v731_v58 = vmul.f32 %v667_v56, %v375_v49  ;;  %v763_v22 = vmul.f32 %v699_v11, %v503_v50  ;;  %v665_v23 = vmin.f32 %v601_v59, 6.0  ;;  %v697_v24 = vmin.f32 %v633_v14, 6.0 }
 0x124   :  { %v604_v16 = vmax.f32 %v540_v15, 0.0  ;;  %v636_v17 = vmax.f32 %v572_v18, 0.0  ;;  %v538_v12 = vadd.f32 3.0, %v370_v21  ;;  %v570_v13 = vadd.f32 3.0, %v498_v57 }
 0x125   :  { %v795_v25 = vmul.f32 0.16666667, %v731_v58  ;;  %v827_v28 = vmul.f32 0.16666667, %v763_v22  ;;  %v729_v29 = vmul.f32 %v665_v23, %v367_v61  ;;  %v761_v30 = vmul.f32 %v697_v24, %v495_v62 }
 0x126   :  { %v668_v31 = vmin.f32 %v604_v16, 6.0  ;;  %v700_v3 = vmin.f32 %v636_v17, 6.0  ;;  %v602_v4 = vmax.f32 %v538_v12, 0.0  ;;  %v634_v35 = vmax.f32 %v570_v13, 0.0 }
 0x127   :  { %860 = vst.msk [vmem:[%s1675_s3 + $0xf0] sm:$0xff] %vm829_vm2, %v795_v25  ;;  %892 = vst.msk [vmem:[%s1675_s3 + $0x1f0] sm:$0xff] %vm829_vm2, %v827_v28  ;;  %v793_v34 = vmul.f32 0.16666667, %v729_v29  ;;  %v825_v32 = vmul.f32 0.16666667, %v761_v30 }
 0x128   :  { %v732_v33 = vmul.f32 %v668_v31, %v378_v9  ;;  %v764_v36 = vmul.f32 %v700_v3, %v506_v10  ;;  %v666_v39 = vmin.f32 %v602_v4, 6.0  ;;  %v698_v26 = vmin.f32 %v634_v35, 6.0 }
 0x129   :  { %858 = vst.msk [vmem:[%s1675_s3 + $0xe0] sm:$0xff] %vm829_vm2, %v793_v34  ;;  %890 = vst.msk [vmem:[%s1675_s3 + $0x1e0] sm:$0xff] %vm829_vm2, %v825_v32 }
 0x12a   :  { %v796_v27 = vmul.f32 0.16666667, %v732_v33  ;;  %v828_v42 = vmul.f32 0.16666667, %v764_v36  ;;  %v730_v43 = vmul.f32 %v666_v39, %v370_v21  ;;  %v762_v44 = vmul.f32 %v698_v26, %v498_v57 }
 0x12c   :  { %861 = vst.msk [vmem:[%s1675_s3 + $0xf8] sm:$0xff] %vm829_vm2, %v796_v27  ;;  %893 = vst.msk [vmem:[%s1675_s3 + $0x1f8] sm:$0xff] %vm829_vm2, %v828_v42  ;;  %v794_v19 = vmul.f32 0.16666667, %v730_v43  ;;  %v826_v20 = vmul.f32 0.16666667, %v762_v44 }
 0x12e   :  { %859 = vst.msk [vmem:[%s1675_s3 + $0xe8] sm:$0xff] %vm829_vm2, %v794_v19  ;;  %891 = vst.msk [vmem:[%s1675_s3 + $0x1e8] sm:$0xff] %vm829_vm2, %v826_v20 }

</bundles_post_ra>
